<compile_context>
chip_gen: v6e
topology: v6e:2x2x1
jax: 0.10.0
libtpu: 0.0.40
codegen_flags: <defaults>
</compile_context>

<pallas_src>
import math

import jax
import jax.numpy as jnp
from jax.experimental import pallas as pl
from jax.experimental.pallas import tpu as pltpu

EPS = 1e-5


def _make_dw_kernel(col_shift, lanes):
    """col_shift = Cp (one image column in the flattened lane axis), lanes = W*Cp."""
    L = lanes

    def dw_kernel(xp_ref, w_ref, b_ref, o_ref):
        # xp_ref : (1, H+2, L) row-padded, channel-padded, W-flattened image
        # w_ref  : (3, 3, L)   fully fused dw 3x3 weights (BN-scaled, identity
        #                      + 1x1 folded into centre tap), edge-masked
        # b_ref  : (1, L)      total bias (bn + bn1 + bn2 shifts)
        # o_ref  : (1, TH, L)
        TH = o_ref.shape[1]
        base = pl.multiple_of(pl.program_id(1) * TH, TH)

        x0 = xp_ref[0, pl.ds(base + 0, TH), :].astype(jnp.float32)   # rows h-1
        x1 = xp_ref[0, pl.ds(base + 1, TH), :].astype(jnp.float32)   # rows h
        x2 = xp_ref[0, pl.ds(base + 2, TH), :].astype(jnp.float32)   # rows h+1

        # Vertical partial sums per kw tap (weights are pre-masked at the
        # image columns that would wrap around under the lane roll).
        t0 = x0 * w_ref[0, 0:1, :] + x1 * w_ref[1, 0:1, :] + x2 * w_ref[2, 0:1, :]
        t1 = x0 * w_ref[0, 1:2, :] + x1 * w_ref[1, 1:2, :] + x2 * w_ref[2, 1:2, :]
        t2 = x0 * w_ref[0, 2:3, :] + x1 * w_ref[1, 2:3, :] + x2 * w_ref[2, 2:3, :]

        acc = t1 + b_ref[...]
        acc = acc + pltpu.roll(t0, col_shift, axis=1)        # w-1 neighbour -> w
        acc = acc + pltpu.roll(t2, L - col_shift, axis=1)    # w+1 neighbour -> w

        o_ref[0] = acc.astype(o_ref.dtype)

    return dw_kernel


def _bn_affine(gamma, beta, mean, var, eps=EPS):
    s = gamma / jnp.sqrt(var + eps)
    return s, beta - mean * s


def _pick_tile_h(H, L):
    """Largest multiple-of-8 divisor of H whose f32 tile stays under ~2 MB."""
    if H % 8 != 0:
        return H                                   # full-dim block is always legal
    budget_rows = max(8, (2 << 20) // (L * 4))
    best = 8
    for th in range(8, H + 1, 8):
        if H % th == 0 and th <= budget_rows:
            best = th
    return best


def dw_forward(x_nchw, params, *, compute_dtype=None):
    """Forward pass of RepViT DW (inference-mode BN)."""
    N, C, H, W = x_nchw.shape
    io_dtype = x_nchw.dtype if compute_dtype is None else compute_dtype

    # ---- lane-dense channel padding: W * Cp must be a multiple of 128 ----
    g = 128 // math.gcd(W, 128)
    Cp = ((C + g - 1) // g) * g
    L = W * Cp
    TH = _pick_tile_h(H, L)

    # ---- single layout pass: NCHW -> (N, H+2, W*Cp) ----
    x = jnp.transpose(x_nchw, (0, 2, 3, 1)).astype(io_dtype)          # (N,H,W,C)
    x = jnp.pad(x, ((0, 0), (1, 1), (0, 0), (0, Cp - C)))             # halo rows + chan pad
    xp = x.reshape(N, H + 2, L)

    # ---- fuse the three BN affines + identity + 1x1 into one 3x3 dw conv ----
    s0, b0 = _bn_affine(params["bn_gamma"], params["bn_beta"],
                        params["bn_mean"], params["bn_var"])
    s1, b1 = _bn_affine(params["bn1_gamma"], params["bn1_beta"],
                        params["bn1_mean"], params["bn1_var"])
    s2, b2 = _bn_affine(params["bn2_gamma"], params["bn2_beta"],
                        params["bn2_mean"], params["bn2_var"])

    w3 = jnp.transpose(params["conv1_w"][:, 0], (1, 2, 0)) * s1        # (3,3,C)
    w3 = w3.at[1, 1].add(s0 + params["conv2_w"][:, 0, 0, 0] * s2)      # identity + 1x1
    b_total = b0 + b1 + b2                                             # (C,)

    def pad_c(a):
        return jnp.pad(a, [(0, 0)] * (a.ndim - 1) + [(0, Cp - C)])

    # per-channel -> per-lane (tile across W); broadcasts hoisted out of kernel
    w_lanes = jnp.tile(pad_c(w3).astype(jnp.float32), (1, 1, W))       # (3,3,L)
    lane = jnp.arange(L)
    # Source-side edge masks (the multiply happens BEFORE the lane roll):
    #   kw=0 tap rolls right by Cp -> zero the LAST image column,
    #   kw=2 tap rolls left  by Cp -> zero the FIRST image column.
    w_lanes = w_lanes.at[:, 0, :].multiply((lane < (W - 1) * Cp).astype(jnp.float32))
    w_lanes = w_lanes.at[:, 2, :].multiply((lane >= Cp).astype(jnp.float32))
    b_l = jnp.tile(pad_c(b_total), W).reshape(1, L).astype(jnp.float32)

    # ---- VMEM budget: explicit, generation-safe ----
    itemsize = jnp.dtype(io_dtype).itemsize
    blk_bytes = (2 * (H + 2) * L + 2 * TH * L) * itemsize \
                + 2 * 10 * L * 4 + 8 * TH * L * 4
    vmem_limit = int(min(max(blk_bytes + (4 << 20), 8 << 20), 64 << 20))

    out = pl.pallas_call(
        _make_dw_kernel(Cp, L),
        out_shape=jax.ShapeDtypeStruct((N, H, L), io_dtype),
        grid=(N, H // TH),
        in_specs=[
            pl.BlockSpec((1, H + 2, L), lambda n, t: (n, 0, 0)),  # resident per image
            pl.BlockSpec((3, 3, L), lambda n, t: (0, 0, 0)),
            pl.BlockSpec((1, L), lambda n, t: (0, 0)),
        ],
        out_specs=pl.BlockSpec((1, TH, L), lambda n, t: (n, t, 0)),
        compiler_params=pltpu.CompilerParams(
            dimension_semantics=("parallel", "parallel"),
            vmem_limit_bytes=vmem_limit,
        ),
    )(xp, w_lanes, b_l)

    out = out.reshape(N, H, W, Cp)[..., :C]
    return jnp.transpose(out, (0, 3, 1, 2)).astype(x_nchw.dtype)       # NCHW


def dw_reference(x_nchw, params):
    """Pure-JAX reference (lax.conv) for correctness checking."""
    N, C, H, W = x_nchw.shape
    x = x_nchw.astype(jnp.float32)

    def bn(y, g, b, m, v):
        s, sh = _bn_affine(g, b, m, v)
        return y * s[None, :, None, None] + sh[None, :, None, None]

    conv1 = jax.lax.conv_general_dilated(
        x, params["conv1_w"], (1, 1), ((1, 1), (1, 1)),
        dimension_numbers=("NCHW", "OIHW", "NCHW"), feature_group_count=C)
    conv2 = jax.lax.conv_general_dilated(
        x, params["conv2_w"], (1, 1), ((0, 0), (0, 0)),
        dimension_numbers=("NCHW", "OIHW", "NCHW"), feature_group_count=C)

    return (bn(x, params["bn_gamma"], params["bn_beta"],
               params["bn_mean"], params["bn_var"])
            + bn(conv1, params["bn1_gamma"], params["bn1_beta"],
                 params["bn1_mean"], params["bn1_var"])
            + bn(conv2, params["bn2_gamma"], params["bn2_beta"],
                 params["bn2_mean"], params["bn2_var"]))


def make_params(key, dims):
    ks = jax.random.split(key, 12)
    return {
        "conv1_w": jax.random.normal(ks[0], (dims, 1, 3, 3), jnp.float32) * 0.2,
        "conv2_w": jax.random.normal(ks[1], (dims, 1, 1, 1), jnp.float32) * 0.2,
        "bn1_gamma": jnp.ones((dims,), jnp.float32),
        "bn1_beta": jnp.zeros((dims,), jnp.float32),
        "bn1_mean": jax.random.normal(ks[2], (dims,), jnp.float32) * 0.1,
        "bn1_var": jax.nn.softplus(jax.random.normal(ks[3], (dims,), jnp.float32)) + 0.5,
        "bn2_gamma": jnp.ones((dims,), jnp.float32),
        "bn2_beta": jnp.zeros((dims,), jnp.float32),
        "bn2_mean": jax.random.normal(ks[4], (dims,), jnp.float32) * 0.1,
        "bn2_var": jax.nn.softplus(jax.random.normal(ks[5], (dims,), jnp.float32)) + 0.5,
        "bn_gamma": jnp.ones((dims,), jnp.float32),
        "bn_beta": jnp.zeros((dims,), jnp.float32),
        "bn_mean": jax.random.normal(ks[6], (dims,), jnp.float32) * 0.1,
        "bn_var": jax.nn.softplus(jax.random.normal(ks[7], (dims,), jnp.float32)) + 0.5,
    }


if __name__ == "__main__":
    # TODO(synk): training-mode BatchNorm (batch-statistic reduction + running
    # stat update) is not implemented; inference (eval-mode) semantics are used.
    key = jax.random.PRNGKey(0)
    k_x, k_p = jax.random.split(key)

    N, C, H, W = 2, 4, 16, 16
    x = jax.random.normal(k_x, (N, C, H, W), jnp.float32)
    params = make_params(k_p, C)

    out = dw_forward(x, params)
    out = jax.block_until_ready(out)

    ref = dw_reference(x, params)
    assert out.shape == (N, C, H, W)
    assert jnp.allclose(out, ref, atol=1e-4, rtol=1e-4), \
        f"max abs err {jnp.max(jnp.abs(out - ref))}"

    print("KERNEL_OK")
</pallas_src>

<mosaic_0001>
module attributes {stable_mosaic.version = 11 : i64} {
  func.func @dw_kernel(%arg0: i32, %arg1: i32, %arg2: memref<1x18x128xf32, #tpu.memory_space<vmem>>, %arg3: memref<3x3x128xf32, #tpu.memory_space<vmem>>, %arg4: memref<1x128xf32, #tpu.memory_space<vmem>>, %arg5: memref<1x16x128xf32, #tpu.memory_space<vmem>>) attributes {dimension_semantics = [#tpu.dimension_semantics<parallel>, #tpu.dimension_semantics<parallel>], iteration_bounds = array<i64: 2, 1>, scalar_prefetch = 0 : i64, scratch_operands = 0 : i64, tpu.core_type = #tpu.core_type<tc>, window_params = [{transform_indices = @transform_0, window_bounds = array<i64: 1, 18, 128>}, {pipeline_mode = #tpu.pipeline_mode<synchronous>, transform_indices = @transform_1, window_bounds = array<i64: 3, 3, 128>}, {pipeline_mode = #tpu.pipeline_mode<synchronous>, transform_indices = @transform_2, window_bounds = array<i64: 1, 128>}, {transform_indices = @transform_3, window_bounds = array<i64: 1, 16, 128>}]} {
    %c16_i32 = arith.constant 16 : i32
    %0 = arith.muli %arg1, %c16_i32 : i32
    %1 = tpu.assume_multiple %0, 16 : i32
    %c0_i32 = arith.constant 0 : i32
    %2 = arith.addi %1, %c0_i32 : i32
    %c0 = arith.constant 0 : index
    %3 = arith.index_cast %2 : i32 to index
    %c0_0 = arith.constant 0 : index
    %4 = vector.load %arg2[%c0, %3, %c0_0] : memref<1x18x128xf32, #tpu.memory_space<vmem>>, vector<1x16x128xf32>
    %5 = vector.shape_cast %4 : vector<1x16x128xf32> to vector<16x128xf32>
    %c1_i32 = arith.constant 1 : i32
    %6 = arith.addi %1, %c1_i32 : i32
    %c0_1 = arith.constant 0 : index
    %7 = arith.index_cast %6 : i32 to index
    %c0_2 = arith.constant 0 : index
    %8 = vector.load %arg2[%c0_1, %7, %c0_2] : memref<1x18x128xf32, #tpu.memory_space<vmem>>, vector<1x16x128xf32>
    %9 = vector.shape_cast %8 : vector<1x16x128xf32> to vector<16x128xf32>
    %c2_i32 = arith.constant 2 : i32
    %10 = arith.addi %1, %c2_i32 : i32
    %c0_3 = arith.constant 0 : index
    %11 = arith.index_cast %10 : i32 to index
    %c0_4 = arith.constant 0 : index
    %12 = vector.load %arg2[%c0_3, %11, %c0_4] : memref<1x18x128xf32, #tpu.memory_space<vmem>>, vector<1x16x128xf32>
    %13 = vector.shape_cast %12 : vector<1x16x128xf32> to vector<16x128xf32>
    %c0_5 = arith.constant 0 : index
    %c0_6 = arith.constant 0 : index
    %c0_7 = arith.constant 0 : index
    %14 = vector.load %arg3[%c0_5, %c0_6, %c0_7] : memref<3x3x128xf32, #tpu.memory_space<vmem>>, vector<1x1x128xf32>
    %15 = vector.shape_cast %14 : vector<1x1x128xf32> to vector<1x128xf32>
    %16 = vector.broadcast %15 : vector<1x128xf32> to vector<16x128xf32>
    %17 = arith.mulf %5, %16 : vector<16x128xf32>
    %c1 = arith.constant 1 : index
    %c0_8 = arith.constant 0 : index
    %c0_9 = arith.constant 0 : index
    %18 = vector.load %arg3[%c1, %c0_8, %c0_9] : memref<3x3x128xf32, #tpu.memory_space<vmem>>, vector<1x1x128xf32>
    %19 = vector.shape_cast %18 : vector<1x1x128xf32> to vector<1x128xf32>
    %20 = vector.broadcast %19 : vector<1x128xf32> to vector<16x128xf32>
    %21 = arith.mulf %9, %20 : vector<16x128xf32>
    %22 = arith.addf %17, %21 : vector<16x128xf32>
    %c2 = arith.constant 2 : index
    %c0_10 = arith.constant 0 : index
    %c0_11 = arith.constant 0 : index
    %23 = vector.load %arg3[%c2, %c0_10, %c0_11] : memref<3x3x128xf32, #tpu.memory_space<vmem>>, vector<1x1x128xf32>
    %24 = vector.shape_cast %23 : vector<1x1x128xf32> to vector<1x128xf32>
    %25 = vector.broadcast %24 : vector<1x128xf32> to vector<16x128xf32>
    %26 = arith.mulf %13, %25 : vector<16x128xf32>
    %27 = arith.addf %22, %26 : vector<16x128xf32>
    %c0_12 = arith.constant 0 : index
    %c1_13 = arith.constant 1 : index
    %c0_14 = arith.constant 0 : index
    %28 = vector.load %arg3[%c0_12, %c1_13, %c0_14] : memref<3x3x128xf32, #tpu.memory_space<vmem>>, vector<1x1x128xf32>
    %29 = vector.shape_cast %28 : vector<1x1x128xf32> to vector<1x128xf32>
    %30 = vector.broadcast %29 : vector<1x128xf32> to vector<16x128xf32>
    %31 = arith.mulf %5, %30 : vector<16x128xf32>
    %c1_15 = arith.constant 1 : index
    %c1_16 = arith.constant 1 : index
    %c0_17 = arith.constant 0 : index
    %32 = vector.load %arg3[%c1_15, %c1_16, %c0_17] : memref<3x3x128xf32, #tpu.memory_space<vmem>>, vector<1x1x128xf32>
    %33 = vector.shape_cast %32 : vector<1x1x128xf32> to vector<1x128xf32>
    %34 = vector.broadcast %33 : vector<1x128xf32> to vector<16x128xf32>
    %35 = arith.mulf %9, %34 : vector<16x128xf32>
    %36 = arith.addf %31, %35 : vector<16x128xf32>
    %c2_18 = arith.constant 2 : index
    %c1_19 = arith.constant 1 : index
    %c0_20 = arith.constant 0 : index
    %37 = vector.load %arg3[%c2_18, %c1_19, %c0_20] : memref<3x3x128xf32, #tpu.memory_space<vmem>>, vector<1x1x128xf32>
    %38 = vector.shape_cast %37 : vector<1x1x128xf32> to vector<1x128xf32>
    %39 = vector.broadcast %38 : vector<1x128xf32> to vector<16x128xf32>
    %40 = arith.mulf %13, %39 : vector<16x128xf32>
    %41 = arith.addf %36, %40 : vector<16x128xf32>
    %c0_21 = arith.constant 0 : index
    %c2_22 = arith.constant 2 : index
    %c0_23 = arith.constant 0 : index
    %42 = vector.load %arg3[%c0_21, %c2_22, %c0_23] : memref<3x3x128xf32, #tpu.memory_space<vmem>>, vector<1x1x128xf32>
    %43 = vector.shape_cast %42 : vector<1x1x128xf32> to vector<1x128xf32>
    %44 = vector.broadcast %43 : vector<1x128xf32> to vector<16x128xf32>
    %45 = arith.mulf %5, %44 : vector<16x128xf32>
    %c1_24 = arith.constant 1 : index
    %c2_25 = arith.constant 2 : index
    %c0_26 = arith.constant 0 : index
    %46 = vector.load %arg3[%c1_24, %c2_25, %c0_26] : memref<3x3x128xf32, #tpu.memory_space<vmem>>, vector<1x1x128xf32>
    %47 = vector.shape_cast %46 : vector<1x1x128xf32> to vector<1x128xf32>
    %48 = vector.broadcast %47 : vector<1x128xf32> to vector<16x128xf32>
    %49 = arith.mulf %9, %48 : vector<16x128xf32>
    %50 = arith.addf %45, %49 : vector<16x128xf32>
    %c2_27 = arith.constant 2 : index
    %c2_28 = arith.constant 2 : index
    %c0_29 = arith.constant 0 : index
    %51 = vector.load %arg3[%c2_27, %c2_28, %c0_29] : memref<3x3x128xf32, #tpu.memory_space<vmem>>, vector<1x1x128xf32>
    %52 = vector.shape_cast %51 : vector<1x1x128xf32> to vector<1x128xf32>
    %53 = vector.broadcast %52 : vector<1x128xf32> to vector<16x128xf32>
    %54 = arith.mulf %13, %53 : vector<16x128xf32>
    %55 = arith.addf %50, %54 : vector<16x128xf32>
    %c0_30 = arith.constant 0 : index
    %c0_31 = arith.constant 0 : index
    %56 = vector.load %arg4[%c0_30, %c0_31] : memref<1x128xf32, #tpu.memory_space<vmem>>, vector<1x128xf32>
    %57 = vector.broadcast %56 : vector<1x128xf32> to vector<16x128xf32>
    %58 = arith.addf %41, %57 : vector<16x128xf32>
    %c8_i32 = arith.constant 8 : i32
    %59 = tpu.dynamic_rotate %27 by %c8_i32 dim 1 : vector<16x128xf32>, i32 -> vector<16x128xf32>
    %60 = arith.addf %58, %59 : vector<16x128xf32>
    %c120_i32 = arith.constant 120 : i32
    %61 = tpu.dynamic_rotate %55 by %c120_i32 dim 1 : vector<16x128xf32>, i32 -> vector<16x128xf32>
    %62 = arith.addf %60, %61 : vector<16x128xf32>
    %c0_32 = arith.constant 0 : index
    %c0_33 = arith.constant 0 : index
    %c0_34 = arith.constant 0 : index
    %63 = vector.load %arg5[%c0_32, %c0_33, %c0_34] : memref<1x16x128xf32, #tpu.memory_space<vmem>>, vector<1x16x128xf32>
    %64 = vector.shape_cast %63 : vector<1x16x128xf32> to vector<16x128xf32>
    %65 = vector.shape_cast %62 : vector<16x128xf32> to vector<1x16x128xf32>
    tpu.vector_store %arg5[%c0_32, %c0_33, %c0_34], %65 {strides = array<i32>} : memref<1x16x128xf32, #tpu.memory_space<vmem>>, vector<1x16x128xf32>,
    return
  }
  func.func @transform_0(%arg0: i32, %arg1: i32) -> (i32, i32, i32) {
    %c0_i32 = arith.constant 0 : i32
    %c0_i32_0 = arith.constant 0 : i32
    %c0_i32_1 = arith.constant 0 : i32
    return %arg0, %c0_i32, %c0_i32_0 : i32, i32, i32
  }
  func.func @transform_1(%arg0: i32, %arg1: i32) -> (i32, i32, i32) {
    %c0_i32 = arith.constant 0 : i32
    %c0_i32_0 = arith.constant 0 : i32
    %c0_i32_1 = arith.constant 0 : i32
    %c0_i32_2 = arith.constant 0 : i32
    return %c0_i32, %c0_i32_0, %c0_i32_1 : i32, i32, i32
  }
  func.func @transform_2(%arg0: i32, %arg1: i32) -> (i32, i32) {
    %c0_i32 = arith.constant 0 : i32
    %c0_i32_0 = arith.constant 0 : i32
    %c0_i32_1 = arith.constant 0 : i32
    return %c0_i32, %c0_i32_0 : i32, i32
  }
  func.func @transform_3(%arg0: i32, %arg1: i32) -> (i32, i32, i32) {
    %c0_i32 = arith.constant 0 : i32
    %c0_i32_0 = arith.constant 0 : i32
    return %arg0, %arg1, %c0_i32 : i32, i32, i32
  }
}

</mosaic_0001>

<bundles_post_ra>
// kernel: tpu_custom_call.1
= control target key start
LH: loop header
LB: loop body
LE: loop exit
PB: predicated region body
PF: predicated region fallthrough
CT: control target
= control target key end

     0   :  { %8 = vsyncpa [#allocation3], 0  ;;  %s734_s0 = inlined_call_operand.vmem [shape: f32[2,18,128], index: 0, kind: input, shape index: {}]   ;;  %s735_s1 = inlined_call_operand.vmem [shape: f32[3,3,128], index: 1, kind: input, shape index: {}]   ;;  %s736_s2 = inlined_call_operand.vmem [shape: f32[1,128], index: 2, kind: input, shape index: {}]   ;;  %s737_s3 = inlined_call_operand.hbm [shape: f32[2,16,128], index: 3, kind: output, shape index: {}]  }
   0x1   :  { %10 = vsyncpa [#allocation3 + $0x1], 0  ;;  %s587_s12 = smov 0   ;;  %s589_s13 = smov 0  }
   0x2   :  { %s591_s14 = smov 0   ;;  %s593_s15 = smov 0  }
   0x3   :  { %s595_s16 = smov 0   ;;  %s597_s17 = smov 0  }
   0x4 LB: > { %s393_s18 = sadd.s32 4294967295, %s561_s17   ;;  %s394_s19 = sadd.s32 4294967294, %s561_s17   ;;  %s561_s17 = sphi %s597_s17, %s16_s17   ;;  %s557_s16 = sphi %s595_s16, %s744_s16   ;;  %s553_s15 = sphi %s593_s15, %s743_s15   ;;  %s549_s14 = sphi %s591_s14, %s742_s14   ;;  %s545_s13 = sphi %s589_s13, %s741_s13   ;;  %s541_s12 = sphi %s587_s12, %s740_s12  }
   0x5   : > { %s28_s20 = sadd.s32 1, %s557_s16  ;;  %s105_s21 = sadd.s32 1, %s549_s14 }
   0x6   : > { %p30_p0 = scmp.ge.s32.totalorder %s28_s20, 2  ;;  %p115_p1 = scmp.ne.s32.totalorder %s549_s14, %s545_s13 }
   0x7   : > { %p116_p2 = scmp.eq.s32.totalorder %s393_s18, 1  ;;  %p121_p3 = scmp.ne.s32.totalorder %s545_s13, %s541_s12 }
   0x8   : > { %s746_s20 = smov (%p30_p0, %s28_s20), 0  ;;  %p122_p5 = scmp.eq.s32.totalorder %s394_s19, 1 }
   0x9   : > { %p627_p4 = por %p116_p2, %p115_p1  ;;  %s100_s23 = ssub.s32 %s557_s16, %s746_s20 }
   0xa   : > { %p397_p6 = scmp.ge.s32.totalorder %s561_s17, 1  ;;  %p103_p7 = scmp.eq.s32.totalorder %s100_s23, 0 }
   0xb   : > { %p634_p8 = por %p122_p5, %p121_p3  ;;  %p154_p9 = scmp.lt.s32.totalorder %s561_s17, 3 }
   0xc   : > { %s640_s25 = scalar_select %p103_p7, %s549_s14, %s105_s21  }
   0xd   : > { %p155_p10 = pnand %p397_p6, %p154_p9 }
   0xe   : > { %p178_p11 = scmp.lt.s32.totalorder (!%p155_p10), %s553_s15, 1  ;;  %s563_s5 = smov (!%p155_p10), 8  }
   0xf   : > { %158 = sbr.rel (%p155_p10) target bundleno = 170 (0xaa), region = 32  ;;  %s564_s6 = smov (!%p155_p10), 120  }
  0x10   : > { %s175_s9 = sand.u32 (!%p155_p10), 1, %s545_s13  }
  0x11   : > { %s398_s10 = sshll.u32 (!%p155_p10), %s175_s9, 4  ;;  %s688_s28 = scalar_lea.sflag (!%p155_p10), [#allocation3], %s175_s9 }
  0x12   : > { %s177_s11 = scalar_lea.vmem (!%p155_p10), [#allocation2], %s398_s10 }
  0x13   : > { %s312_s18 = sshll.u32 (!%p155_p10), %s177_s11, 4  ;;  %s681_s18 = int_to_ptr.vmem [resolvable:$true] %s312_s18 }
  0x14   : > { %s179_s26 = scalar_select %p178_p11, %s553_s15, 1  ;;  %v404_v0 = vld [vmem:[%s735_s1] ss:$0 sm:$0xff]  ;;  %v406_v1 = vld [vmem:[%s735_s1 + $0x4] ss:$0 sm:$0xff] }
  0x15   : > { %v408_v2 = vld [vmem:[%s735_s1 + $0x8] ss:$0 sm:$0xff]  ;;  %v414_v3 = vld [vmem:[%s735_s1 + $0x2] ss:$0 sm:$0xff]  ;;  %v416_v4 = vld [vmem:[%s735_s1 + $0x6] ss:$0 sm:$0xff] }
  0x16   : > { %s426_s27 = smul.u32 24, %s179_s26  ;;  %v418_v5 = vld [vmem:[%s735_s1 + $0xa] ss:$0 sm:$0xff]  ;;  %v409_v6 = vld [vmem:[%s735_s1 + $0x1] ss:$0 sm:$0xff]  ;;  %s485_s29 = scalar_lea.vmem %s681_s18, 256 }
  0x17   : > { %v411_v7 = vld [vmem:[%s735_s1 + $0x5] ss:$0 sm:$0xff]  ;;  %v413_v22 = vld [vmem:[%s735_s1 + $0x9] ss:$0 sm:$0xff]  ;;  %v419_v45 = vld [vmem:[%s736_s2] ss:$0 sm:$0xff]  ;;  %p486_p12 = scmp.ne.s32.totalorder %s681_s18, %s485_s29 }
  0x18   : > { %s182_s19 = scalar_lea.vmem %s734_s0, %s426_s27 }
  0x19   : > { %v186_v8 = vld [vmem:[%s182_s19] sm:$0xff]  ;;  %v187_v9 = vld [vmem:[%s182_s19 + $0x8] sm:$0xff]  ;;  %p487_p13 = pnand %p486_p12, %p627_p4 }
  0x1a   : > { %v400_v10 = vld [vmem:[%s182_s19 + $0x1] sm:$0xff]  ;;  %v401_v11 = vld [vmem:[%s182_s19 + $0x9] sm:$0xff]  ;;  %v201_v14 = vmul.f32 %v404_v0, %v186_v8  ;;  %v202_v15 = vmul.f32 %v404_v0, %v187_v9  ;;  %v253_v17 = vmul.f32 %v414_v3, %v186_v8  ;;  %v254_v21 = vmul.f32 %v414_v3, %v187_v9 }
  0x1b   : > { %v402_v12 = vld [vmem:[%s182_s19 + $0x2] sm:$0xff]  ;;  %v403_v13 = vld [vmem:[%s182_s19 + $0xa] sm:$0xff]  ;;  %v209_v16 = vmul.f32 %v406_v1, %v400_v10  ;;  %v210_v18 = vmul.f32 %v406_v1, %v401_v11  ;;  %v260_v24 = vmul.f32 %v416_v4, %v400_v10  ;;  %v261_v25 = vmul.f32 %v416_v4, %v401_v11  ;;  %s425_s19 = sshll.u32 %s553_s15, 8  ;;  %p488_p0 = pneg %p487_p13 }
  0x1c   : > { %v219_v19 = vmul.f32 %v408_v2, %v402_v12  ;;  %v220_v20 = vmul.f32 %v408_v2, %v403_v13  ;;  %v269_v26 = vmul.f32 %v418_v5, %v402_v12  ;;  %v270_v27 = vmul.f32 %v418_v5, %v403_v13  ;;  %s686_s26 = scalar_lea.hbm %s737_s3, %s425_s19  ;;  %s565_s15 = smov [#allocation2]  }
  0x1d   : > { %v211_v23 = vadd.f32 %v209_v16, %v201_v14  ;;  %v212_v28 = vadd.f32 %v210_v18, %v202_v15  ;;  %v228_v29 = vmul.f32 %v409_v6, %v186_v8  ;;  %v235_v30 = vmul.f32 %v411_v7, %v400_v10  ;;  %s489_s30 = sshll.u32 %s565_s15, 4  ;;  %s490_s30 = int_to_ptr.vmem [resolvable:$false] %s489_s30 }
  0x1e   : > { %v262_v32 = vadd.f32 %v260_v24, %v253_v17  ;;  %v263_v33 = vadd.f32 %v261_v25, %v254_v21  ;;  %v244_v34 = vmul.f32 %v413_v22, %v402_v12  ;;  %v229_v36 = vmul.f32 %v409_v6, %v187_v9  ;;  %s491_s27 = scalar_lea.vmem %s490_s30, 512  ;;  %p492_p1 = scmp.lt.s32.totalorder %s681_s18, %s490_s30 }
  0x1f   : > { %v221_v31 = vadd.f32 %v219_v19, %v211_v23  ;;  %v237_v35 = vadd.f32 %v235_v30, %v228_v29  ;;  %v236_v37 = vmul.f32 %v411_v7, %v401_v11  ;;  %v222_v39 = vadd.f32 %v220_v20, %v212_v28  ;;  %p493_p2 = scmp.lt.s32.totalorder %s491_s27, %s485_s29 }
  0x20   : > { %v271_v38 = vadd.f32 %v269_v26, %v262_v32  ;;  %v245_v40 = vmul.f32 %v413_v22, %v403_v13  ;;  %v272_v43 = vadd.f32 %v270_v27, %v263_v33 }
  0x21   : > { %282 = vrot.lane.b32.xlu0 %v221_v31, %s563_s5  ;;  %v246_v41 = vadd.f32 %v244_v34, %v237_v35  ;;  %v238_v42 = vadd.f32 %v236_v37, %v229_v36  ;;  %p494_p3 = por %p493_p2, %p492_p1 }
  0x22   : > { %288 = vrot.lane.b32.xlu1 %v271_v38, %s564_s6 }
  0x23   : > { %v247_v44 = vadd.f32 %v245_v40, %v238_v42  ;;  %v280_v46 = vadd.f32 %v419_v45, %v246_v41  ;;  %p495_p5 = pnand %p494_p3, %p488_p0 }
  0x25   : > { %284 = vrot.lane.b32.xlu0 %v222_v39, %s563_s5  ;;  %v281_v49 = vadd.f32 %v419_v45, %v247_v44 }
  0x26   : > { %290 = vrot.lane.b32.xlu1 %v272_v43, %s564_s6 }
  0x93   : > { %v283_v47 = vpop.permute.xlu0 %282 }
  0x94   : > { %v286_v48 = vadd.f32 %v283_v47, %v280_v46  ;;  %v289_v50 = vpop.permute.xlu1 %288 }
  0x96   : > { %v292_v51 = vadd.f32 %v289_v50, %v286_v48 }
  0x97   : > { %v285_v52 = vpop.permute.xlu0 %284 }
  0x98   : > { %294 = vst [vmem:[%s177_s11] sm:$0xff] %v292_v51  ;;  %v287_v53 = vadd.f32 %v285_v52, %v281_v49  ;;  %v291_v54 = vpop.permute.xlu1 %290 }
  0x9a   : > { %v293_v55 = vadd.f32 %v291_v54, %v287_v53 }
  0x9c   : > { %295 = vst [vmem:[%s177_s11 + $0x8] sm:$0xff] %v293_v55 }
  0x9d   : > { %498 = shalt.err (!%p495_p5)
}
  0x9e   : > { %s499_s4 = scalar_lea.hbm %s686_s26, 256  ;;  %s503_s8 = scalar_lea.hbm %s737_s3, 512 }
  0x9f   : > { %p500_p6 = scmp.ne.s32.totalorder %s686_s26, %s499_s4  ;;  %p504_p10 = scmp.lt.s32.totalorder %s686_s26, %s737_s3 }
  0xa0   : > { %p505_p11 = scmp.lt.s32.totalorder %s503_s8, %s499_s4 }
  0xa1   : > { %p501_p7 = pnand %p500_p6, %p627_p4 }
  0xa2   : > { %p506_p12 = por %p505_p11, %p504_p10 }
  0xa3   : > { %p502_p9 = pneg %p501_p7 }
  0xa5   : > { %p507_p13 = pnand %p506_p12, %p502_p9 }
  0xa7   : > { %510 = shalt.err (!%p507_p13)
}
  0xa8   : > { %s566_s11 = smov 128  }
  0xa9   : > { %427 = dma.vmem_to_hbm [thread:$0]  (%p627_p4), %s681_s18, 256, %s686_s26, %s688_s28, %s566_s11, %s566_s11, %s563_s5  }
  0xaa PF: > { %p433_p0 = scmp.ge.s32.totalorder %s561_s17, 2  ;;  %s327_s19 = sand.u32 1, %s541_s12  }
  0xab   : > { %s328_s21 = scalar_lea.sflag [#allocation3], %s327_s19 }
  0xac   : > { %p430_p1 = pnand %p433_p0, %p634_p8 }
  0xae   : > { %p431_p2 = pneg %p430_p1 }
  0xb0   : > { %536 = dma.done.wait (%p431_p2), %s328_s21, 256  }
  0xb1   : > { %538 = vsyncadd (%p431_p2), %s328_s21, 4294967040  ;;  %s16_s17 = sadd.s32 1, %s561_s17   ;;  %s740_s12 = smov %s545_s13 }
  0xb2   : > { %p13_p3 = scmp.ge.s32.totalorder %s16_s17, 4   ;;  %s741_s13 = smov %s549_s14 }
  0xb3   : > { %s742_s14 = smov %s640_s25  ;;  %s743_s15 = smov %s557_s16 }
  0xb4   : > { %s744_s16 = smov %s746_s20  ;;  %15 = sbr.rel (!%p13_p3) target bundleno = 4 (0x4), region = 72 }
  0xb9   :  { %333 = vsyncpa [#allocation3], 1 }
  0xba   :  { %335 = vsyncpa [#allocation3 + $0x1], 1 }

</bundles_post_ra>
